<compile_context>
chip_gen: v7x
topology: tpu7x:2x2x1
jax: 0.10.0
libtpu: 0.0.40
codegen_flags: <defaults>
</compile_context>

<pallas_src>
import functools

import jax
import jax.numpy as jnp
from jax.experimental import pallas as pl
from jax.experimental.pallas import tpu as pltpu


def _round_up(x, m):
    return ((x + m - 1) // m) * m


# ---------------------------------------------------------------------------
# Tap-window helper: window `off` of the flattened input, sliced directly from the
# tile block and the halo block (no full-tile concat copy).
# ---------------------------------------------------------------------------
def _tap_window(x_ref, h_ref, off, TP):
    if off == 0:
        return x_ref[0]                                   # (Cin, TP)
    if off == TP:                                         # only possible when TP == TPH
        return h_ref[0, :, :TP]
    return jnp.concatenate([x_ref[0, :, off:], h_ref[0, :, :off]], axis=-1)


def _tap_offsets(W):
    return [di * W + dj for di in range(3) for dj in range(3)]


# ---------------------------------------------------------------------------
# Fused kernel, stacked-K path (small Cin): one dot with K = 9*Cin + 1 (bias row).
#   x_ref: (1, Cin, TP)    flat tile     h_ref: (1, Cin, TPH)  halo (>= 2W+2)
#   w_ref: (cb, 9*Cin+1)   BN scale folded, last column = BN shift
#   o_ref: (1, cb, TP)     lane-dense flat NCHW output tile (f32)
# ---------------------------------------------------------------------------
def _conv_bn_relu_stacked_kernel(x_ref, h_ref, w_ref, o_ref, *, W, TP):
    wins = [_tap_window(x_ref, h_ref, off, TP) for off in _tap_offsets(W)]
    ones = jnp.ones((1, TP), x_ref.dtype)                 # bias row -> BN shift via MXU
    stacked = jnp.concatenate(wins + [ones], axis=0)      # (9*Cin+1, TP)
    out = jnp.dot(w_ref[...], stacked, preferred_element_type=jnp.float32)
    o_ref[0] = jnp.maximum(out, 0.0)


# ---------------------------------------------------------------------------
# Fused kernel, per-tap path (Cin >= 128 already fills the MXU contraction).
#   w_ref: (9, cb, Cin)   shift_ref: (cb, 1)
# ---------------------------------------------------------------------------
def _conv_bn_relu_pertap_kernel(x_ref, h_ref, w_ref, shift_ref, o_ref, *, W, TP):
    acc = jnp.broadcast_to(shift_ref[...].astype(jnp.float32), o_ref.shape[1:])
    for k, off in enumerate(_tap_offsets(W)):
        acc = acc + jnp.dot(w_ref[k], _tap_window(x_ref, h_ref, off, TP),
                            preferred_element_type=jnp.float32)
    o_ref[0] = jnp.maximum(acc, 0.0)


# ---------------------------------------------------------------------------
# Wrapper: layout glue only (flatten + zero-pad tail + final crop); FLOPs in-kernel.
# ---------------------------------------------------------------------------
def conv_forward(x_nchw, params, pool=False, *, tp_target=1024,
                 compute_dtype=jnp.bfloat16, stack_taps=None, crop=True,
                 vmem_budget_bytes=24 * 2**20):
    """Forward of Conv(inc, ouc) with defaults k=3, s=1, p=0, g=1, act=True, drop=False."""
    N, Cin, H, W = x_nchw.shape
    Cout = params['w_stk'].shape[0]
    assert H >= 3 and W >= 3, "k=3, p=0 conv needs spatial >= 3"
    Ho, Wo = H - 2, W - 2
    p_out = Ho * W                  # computed on a W-wide grid; cols Wo..W-1 discarded

    if stack_taps is None:
        stack_taps = Cin < 128      # per feedback: per-tap loop only once K=Cin fills MXU

    # Cout blocking: bounds weight/output VMEM and gives v7x's 2 TCs parallel work.
    if Cout % 256 == 0 and Cout > 256:
        cb = 256
    elif Cout % 128 == 0 and Cout > 128:
        cb = 128
    else:
        cb = Cout
    n_co = Cout // cb

    halo = 2 * W + 2                                  # flat reach of tap (di=2, dj=2)
    tph = _round_up(halo, 128)                        # lane-aligned halo block
    itm = jnp.dtype(compute_dtype).itemsize
    Kp = 9 * Cin + 1

    def footprint(tp_):
        # double-buffered pipeline blocks + rough in-kernel temporaries
        xin = 2 * Cin * (tp_ + tph) * itm
        wgt = 2 * (Kp * cb * itm if stack_taps else (9 * cb * Cin + cb) * itm)
        out = 2 * cb * tp_ * 4
        tmp = (Kp * tp_ * itm if stack_taps else Cin * tp_ * itm) + cb * tp_ * 4
        return xin + wgt + out + int(1.5 * tmp)

    tp = max(tph, _round_up(min(tp_target, p_out), tph))
    while tp > tph and footprint(tp) > vmem_budget_bytes:
        tp -= tph
    # TODO(synk): tp is still coupled to tph (tp % tph == 0); for very wide images
    # (tph ~ 2W rounded up to 128) this forces a large minimum spatial tile.
    n_t = pl.cdiv(p_out, tp)
    ratio = tp // tph
    vmem_limit = int(min(64 * 2**20, max(32 * 2**20, int(1.5 * footprint(tp)))))

    # Flatten spatial row-major (free for NCHW), cast activations to the compute dtype
    # (halves HBM traffic for bf16), and zero-pad so every (tile, halo) read is in bounds.
    pin = n_t * tp + tph
    x_flat = x_nchw.reshape(N, Cin, H * W).astype(compute_dtype)
    x_flat = jnp.pad(x_flat, ((0, 0), (0, 0), (0, pin - H * W)))

    flops = 2 * N * n_t * tp * 9 * Cin * Cout
    w_bytes = (Kp * Cout if stack_taps else 9 * Cout * Cin + Cout) * itm
    bytes_accessed = (N * n_co * n_t * Cin * (tp + tph) * itm
                      + N * Cout * n_t * tp * 4 + N * w_bytes)

    x_spec = pl.BlockSpec((1, Cin, tp), lambda n, co, t: (n, 0, t))
    h_spec = pl.BlockSpec((1, Cin, tph), lambda n, co, t: (n, 0, (t + 1) * ratio))

    if stack_taps:
        kernel = functools.partial(_conv_bn_relu_stacked_kernel, W=W, TP=tp)
        w_arg = params['w_stk'].astype(compute_dtype)            # (Cout, 9*Cin+1)
        in_specs = [x_spec, h_spec,
                    pl.BlockSpec((cb, Kp), lambda n, co, t: (co, 0))]
        args = (x_flat, x_flat, w_arg)
    else:
        kernel = functools.partial(_conv_bn_relu_pertap_kernel, W=W, TP=tp)
        w_arg = params['w9'].astype(compute_dtype)               # (9, Cout, Cin)
        in_specs = [x_spec, h_spec,
                    pl.BlockSpec((9, cb, Cin), lambda n, co, t: (0, co, 0)),
                    pl.BlockSpec((cb, 1), lambda n, co, t: (co, 0))]
        args = (x_flat, x_flat, w_arg, params['shift'])

    y = pl.pallas_call(
        kernel,
        out_shape=jax.ShapeDtypeStruct((N, Cout, n_t * tp), jnp.float32),
        grid=(N, n_co, n_t),
        in_specs=in_specs,
        out_specs=pl.BlockSpec((1, cb, tp), lambda n, co, t: (n, co, t)),
        compiler_params=pltpu.CompilerParams(
            dimension_semantics=("parallel", "parallel", "parallel"),
            vmem_limit_bytes=vmem_limit),
        cost_estimate=pl.CostEstimate(flops=flops, transcendentals=0,
                                      bytes_accessed=bytes_accessed),
    )(*args)

    if not crop and not pool:
        # Padded flat layout (cols Wo..W-1 of each row + tail are garbage); lets a
        # fused consumer skip the crop pass below entirely.
        return y

    # TODO(synk): this crop (and the pool) is one extra HBM pass over the output;
    # fusing it into the kernel store would break the lane-dense flat layout for
    # small W, so it stays wrapper-side (XLA fuses the crop into the pool input).
    y = y[:, :, :p_out].reshape(N, Cout, Ho, W)[:, :, :, :Wo]

    if pool:
        # TODO(synk): MaxPool2d(2) runs as plain-JAX reduce_window, not inside the kernel.
        y = jax.lax.reduce_window(y, -jnp.inf, jax.lax.max,
                                  (1, 1, 2, 2), (1, 1, 2, 2), 'VALID')
    return y


# ---------------------------------------------------------------------------
# Deterministic parameter init (shapes from Conv.__init__: conv bias=False, BN(ouc))
# ---------------------------------------------------------------------------
def init_params(key, inc, ouc, eps=1e-5):
    ks = jax.random.split(key, 5)
    w = 0.2 * jax.random.normal(ks[0], (ouc, inc, 3, 3), jnp.float32)
    gamma = 1.0 + 0.1 * jax.random.normal(ks[1], (ouc,), jnp.float32)
    beta = 0.1 * jax.random.normal(ks[2], (ouc,), jnp.float32)
    rmean = 0.1 * jax.random.normal(ks[3], (ouc,), jnp.float32)
    rvar = jnp.abs(jax.random.normal(ks[4], (ouc,), jnp.float32)) + 0.5

    # TODO(synk): BatchNorm2d is modeled in eval mode (folded running stats);
    # train-mode batch statistics and the optional Dropout branch are not reproduced.
    scale = gamma / jnp.sqrt(rvar + eps)
    shift = beta - rmean * scale

    w_taps = w.reshape(ouc, inc, 9)                                  # [o, i, di*3+dj]
    # Stacked layout (Cout, 9*Cin + 1): BN scale folded, BN shift as bias column.
    w_stk = jnp.transpose(w_taps, (0, 2, 1)).reshape(ouc, 9 * inc) * scale[:, None]
    w_stk = jnp.concatenate([w_stk, shift[:, None]], axis=1)
    # Per-tap layout (9, Cout, Cin), BN scale folded (used when Cin >= 128).
    w9 = jnp.transpose(w_taps, (2, 0, 1)) * scale[None, :, None]
    return {
        # PyTorch-layout params (for the reference check)
        'w': w, 'gamma': gamma, 'beta': beta, 'rmean': rmean, 'rvar': rvar, 'eps': eps,
        # Kernel-layout params
        'w_stk': w_stk, 'w9': w9, 'shift': shift.reshape(ouc, 1),
    }


# ---------------------------------------------------------------------------
# Pure-JAX reference (lax conv, NCHW) for validation
# ---------------------------------------------------------------------------
def reference_forward(x, p):
    dn = jax.lax.conv_dimension_numbers(x.shape, p['w'].shape, ('NCHW', 'OIHW', 'NCHW'))
    y = jax.lax.conv_general_dilated(x, p['w'], (1, 1), 'VALID', dimension_numbers=dn)
    scale = p['gamma'] / jnp.sqrt(p['rvar'] + p['eps'])
    shift = p['beta'] - p['rmean'] * scale
    y = y * scale[None, :, None, None] + shift[None, :, None, None]
    return jnp.maximum(y, 0.0)


if __name__ == "__main__":
    inc, ouc = 4, 8
    N, H, W = 2, 16, 16

    key = jax.random.PRNGKey(0)
    kx, kp = jax.random.split(key)
    x = jax.random.normal(kx, (N, inc, H, W), jnp.float32)
    params = init_params(kp, inc, ouc)
    ref = reference_forward(x, params)

    # 1) Production-sized tile, f32 operands: strict check.
    out = jax.block_until_ready(jax.jit(functools.partial(
        conv_forward, compute_dtype=jnp.float32))(x, params))
    assert out.shape == (N, ouc, H - 2, W - 2), out.shape
    err = float(jnp.max(jnp.abs(out - ref)))
    assert jnp.allclose(out, ref, atol=1e-3, rtol=1e-3), f"f32 stacked path err={err}"

    # 2) Default bf16 MXU operands, small tile so the multi-tile halo path is exercised.
    out_bf = jax.block_until_ready(jax.jit(functools.partial(
        conv_forward, tp_target=128))(x, params))
    err_bf = float(jnp.max(jnp.abs(out_bf - ref)))
    assert jnp.allclose(out_bf, ref, atol=1e-1, rtol=2e-2), f"bf16 path err={err_bf}"

    # 3) Per-tap (large-Cin) code path, forced at toy size, f32, multi-tile.
    out_pt = jax.block_until_ready(jax.jit(functools.partial(
        conv_forward, compute_dtype=jnp.float32, stack_taps=False, tp_target=128))(x, params))
    err_pt = float(jnp.max(jnp.abs(out_pt - ref)))
    assert jnp.allclose(out_pt, ref, atol=1e-3, rtol=1e-3), f"per-tap path err={err_pt}"

    # 4) pool=True path.
    ref_pool = jax.lax.reduce_window(ref, -jnp.inf, jax.lax.max,
                                     (1, 1, 2, 2), (1, 1, 2, 2), 'VALID')
    out_pool = jax.block_until_ready(jax.jit(functools.partial(
        conv_forward, pool=True, compute_dtype=jnp.float32))(x, params))
    assert out_pool.shape == ref_pool.shape, out_pool.shape
    assert jnp.allclose(out_pool, ref_pool, atol=1e-3, rtol=1e-3), "pool path mismatch"

    print("KERNEL_OK")
</pallas_src>

<mosaic_0001>
module attributes {stable_mosaic.version = 11 : i64} {
  func.func @_conv_bn_relu_stacked_kernel(%arg0: i32, %arg1: i32, %arg2: i32, %arg3: memref<1x4x256xf32, #tpu.memory_space<vmem>>, %arg4: memref<1x4x128xf32, #tpu.memory_space<vmem>>, %arg5: memref<8x37xf32, #tpu.memory_space<vmem>>, %arg6: memref<1x8x256xf32, #tpu.memory_space<vmem>>) attributes {dimension_semantics = [#tpu.dimension_semantics<parallel>, #tpu.dimension_semantics<parallel>, #tpu.dimension_semantics<parallel>], iteration_bounds = array<i64: 2, 1, 1>, scalar_prefetch = 0 : i64, scratch_operands = 0 : i64, tpu.core_type = #tpu.core_type<tc>, window_params = [{transform_indices = @transform_0, window_bounds = array<i64: 1, 4, 256>}, {transform_indices = @transform_1, window_bounds = array<i64: 1, 4, 128>}, {transform_indices = @transform_2, window_bounds = array<i64: 8, 37>}, {transform_indices = @transform_3, window_bounds = array<i64: 1, 8, 256>}]} {
    %c0 = arith.constant 0 : index
    %c0_0 = arith.constant 0 : index
    %c0_1 = arith.constant 0 : index
    %0 = vector.load %arg3[%c0, %c0_0, %c0_1] : memref<1x4x256xf32, #tpu.memory_space<vmem>>, vector<1x4x256xf32>
    %1 = vector.shape_cast %0 : vector<1x4x256xf32> to vector<4x256xf32>
    %c0_2 = arith.constant 0 : index
    %c0_3 = arith.constant 0 : index
    %c1 = arith.constant 1 : index
    %2 = vector.load %arg3[%c0_2, %c0_3, %c1] : memref<1x4x256xf32, #tpu.memory_space<vmem>>, vector<1x4x255xf32>
    %3 = vector.shape_cast %2 : vector<1x4x255xf32> to vector<4x255xf32>
    %c0_4 = arith.constant 0 : index
    %c0_5 = arith.constant 0 : index
    %c0_6 = arith.constant 0 : index
    %4 = vector.load %arg4[%c0_4, %c0_5, %c0_6] : memref<1x4x128xf32, #tpu.memory_space<vmem>>, vector<1x4x1xf32>
    %5 = vector.shape_cast %4 : vector<1x4x1xf32> to vector<4x1xf32>
    %6 = tpu.concatenate %3, %5 in 1 : vector<4x255xf32>, vector<4x1xf32> -> vector<4x256xf32>
    %c0_7 = arith.constant 0 : index
    %c0_8 = arith.constant 0 : index
    %c2 = arith.constant 2 : index
    %7 = vector.load %arg3[%c0_7, %c0_8, %c2] : memref<1x4x256xf32, #tpu.memory_space<vmem>>, vector<1x4x254xf32>
    %8 = vector.shape_cast %7 : vector<1x4x254xf32> to vector<4x254xf32>
    %c0_9 = arith.constant 0 : index
    %c0_10 = arith.constant 0 : index
    %c0_11 = arith.constant 0 : index
    %9 = vector.load %arg4[%c0_9, %c0_10, %c0_11] : memref<1x4x128xf32, #tpu.memory_space<vmem>>, vector<1x4x2xf32>
    %10 = vector.shape_cast %9 : vector<1x4x2xf32> to vector<4x2xf32>
    %11 = tpu.concatenate %8, %10 in 1 : vector<4x254xf32>, vector<4x2xf32> -> vector<4x256xf32>
    %c0_12 = arith.constant 0 : index
    %c0_13 = arith.constant 0 : index
    %c16 = arith.constant 16 : index
    %12 = vector.load %arg3[%c0_12, %c0_13, %c16] : memref<1x4x256xf32, #tpu.memory_space<vmem>>, vector<1x4x240xf32>
    %13 = vector.shape_cast %12 : vector<1x4x240xf32> to vector<4x240xf32>
    %c0_14 = arith.constant 0 : index
    %c0_15 = arith.constant 0 : index
    %c0_16 = arith.constant 0 : index
    %14 = vector.load %arg4[%c0_14, %c0_15, %c0_16] : memref<1x4x128xf32, #tpu.memory_space<vmem>>, vector<1x4x16xf32>
    %15 = vector.shape_cast %14 : vector<1x4x16xf32> to vector<4x16xf32>
    %16 = tpu.concatenate %13, %15 in 1 : vector<4x240xf32>, vector<4x16xf32> -> vector<4x256xf32>
    %c0_17 = arith.constant 0 : index
    %c0_18 = arith.constant 0 : index
    %c17 = arith.constant 17 : index
    %17 = vector.load %arg3[%c0_17, %c0_18, %c17] : memref<1x4x256xf32, #tpu.memory_space<vmem>>, vector<1x4x239xf32>
    %18 = vector.shape_cast %17 : vector<1x4x239xf32> to vector<4x239xf32>
    %c0_19 = arith.constant 0 : index
    %c0_20 = arith.constant 0 : index
    %c0_21 = arith.constant 0 : index
    %19 = vector.load %arg4[%c0_19, %c0_20, %c0_21] : memref<1x4x128xf32, #tpu.memory_space<vmem>>, vector<1x4x17xf32>
    %20 = vector.shape_cast %19 : vector<1x4x17xf32> to vector<4x17xf32>
    %21 = tpu.concatenate %18, %20 in 1 : vector<4x239xf32>, vector<4x17xf32> -> vector<4x256xf32>
    %c0_22 = arith.constant 0 : index
    %c0_23 = arith.constant 0 : index
    %c18 = arith.constant 18 : index
    %22 = vector.load %arg3[%c0_22, %c0_23, %c18] : memref<1x4x256xf32, #tpu.memory_space<vmem>>, vector<1x4x238xf32>
    %23 = vector.shape_cast %22 : vector<1x4x238xf32> to vector<4x238xf32>
    %c0_24 = arith.constant 0 : index
    %c0_25 = arith.constant 0 : index
    %c0_26 = arith.constant 0 : index
    %24 = vector.load %arg4[%c0_24, %c0_25, %c0_26] : memref<1x4x128xf32, #tpu.memory_space<vmem>>, vector<1x4x18xf32>
    %25 = vector.shape_cast %24 : vector<1x4x18xf32> to vector<4x18xf32>
    %26 = tpu.concatenate %23, %25 in 1 : vector<4x238xf32>, vector<4x18xf32> -> vector<4x256xf32>
    %c0_27 = arith.constant 0 : index
    %c0_28 = arith.constant 0 : index
    %c32 = arith.constant 32 : index
    %27 = vector.load %arg3[%c0_27, %c0_28, %c32] : memref<1x4x256xf32, #tpu.memory_space<vmem>>, vector<1x4x224xf32>
    %28 = vector.shape_cast %27 : vector<1x4x224xf32> to vector<4x224xf32>
    %c0_29 = arith.constant 0 : index
    %c0_30 = arith.constant 0 : index
    %c0_31 = arith.constant 0 : index
    %29 = vector.load %arg4[%c0_29, %c0_30, %c0_31] : memref<1x4x128xf32, #tpu.memory_space<vmem>>, vector<1x4x32xf32>
    %30 = vector.shape_cast %29 : vector<1x4x32xf32> to vector<4x32xf32>
    %31 = tpu.concatenate %28, %30 in 1 : vector<4x224xf32>, vector<4x32xf32> -> vector<4x256xf32>
    %c0_32 = arith.constant 0 : index
    %c0_33 = arith.constant 0 : index
    %c33 = arith.constant 33 : index
    %32 = vector.load %arg3[%c0_32, %c0_33, %c33] : memref<1x4x256xf32, #tpu.memory_space<vmem>>, vector<1x4x223xf32>
    %33 = vector.shape_cast %32 : vector<1x4x223xf32> to vector<4x223xf32>
    %c0_34 = arith.constant 0 : index
    %c0_35 = arith.constant 0 : index
    %c0_36 = arith.constant 0 : index
    %34 = vector.load %arg4[%c0_34, %c0_35, %c0_36] : memref<1x4x128xf32, #tpu.memory_space<vmem>>, vector<1x4x33xf32>
    %35 = vector.shape_cast %34 : vector<1x4x33xf32> to vector<4x33xf32>
    %36 = tpu.concatenate %33, %35 in 1 : vector<4x223xf32>, vector<4x33xf32> -> vector<4x256xf32>
    %c0_37 = arith.constant 0 : index
    %c0_38 = arith.constant 0 : index
    %c34 = arith.constant 34 : index
    %37 = vector.load %arg3[%c0_37, %c0_38, %c34] : memref<1x4x256xf32, #tpu.memory_space<vmem>>, vector<1x4x222xf32>
    %38 = vector.shape_cast %37 : vector<1x4x222xf32> to vector<4x222xf32>
    %c0_39 = arith.constant 0 : index
    %c0_40 = arith.constant 0 : index
    %c0_41 = arith.constant 0 : index
    %39 = vector.load %arg4[%c0_39, %c0_40, %c0_41] : memref<1x4x128xf32, #tpu.memory_space<vmem>>, vector<1x4x34xf32>
    %40 = vector.shape_cast %39 : vector<1x4x34xf32> to vector<4x34xf32>
    %41 = tpu.concatenate %38, %40 in 1 : vector<4x222xf32>, vector<4x34xf32> -> vector<4x256xf32>
    %cst = arith.constant 1.000000e+00 : f32
    %42 = vector.broadcast %cst : f32 to vector<1x256xf32>
    %43 = tpu.concatenate %1, %6, %11, %16, %21, %26, %31, %36, %41, %42 in 0 : vector<4x256xf32>, vector<4x256xf32>, vector<4x256xf32>, vector<4x256xf32>, vector<4x256xf32>, vector<4x256xf32>, vector<4x256xf32>, vector<4x256xf32>, vector<4x256xf32>, vector<1x256xf32> -> vector<37x256xf32>
    %c0_42 = arith.constant 0 : index
    %c0_43 = arith.constant 0 : index
    %44 = vector.load %arg5[%c0_42, %c0_43] : memref<8x37xf32, #tpu.memory_space<vmem>>, vector<8x37xf32>
    %cst_44 = arith.constant dense<0.000000e+00> : vector<8x256xf32>
    %45 = tpu.matmul %44, %43, %cst_44 {dimension_numbers = #tpu.dot_dimension_numbers<[1], [0], [0], [1], [0, 0, 1, 1], [], []>} : vector<8x37xf32>, vector<37x256xf32>, vector<8x256xf32> -> vector<8x256xf32>
    %cst_45 = arith.constant 0.000000e+00 : f32
    %46 = vector.broadcast %cst_45 : f32 to vector<8x256xf32>
    %47 = arith.maximumf %45, %46 : vector<8x256xf32>
    %c0_46 = arith.constant 0 : index
    %c0_47 = arith.constant 0 : index
    %c0_48 = arith.constant 0 : index
    %48 = vector.load %arg6[%c0_46, %c0_47, %c0_48] : memref<1x8x256xf32, #tpu.memory_space<vmem>>, vector<1x8x256xf32>
    %49 = vector.shape_cast %48 : vector<1x8x256xf32> to vector<8x256xf32>
    %50 = vector.shape_cast %47 : vector<8x256xf32> to vector<1x8x256xf32>
    tpu.vector_store %arg6[%c0_46, %c0_47, %c0_48], %50 {strides = array<i32>} : memref<1x8x256xf32, #tpu.memory_space<vmem>>, vector<1x8x256xf32>,
    return
  }
  func.func @transform_0(%arg0: i32, %arg1: i32, %arg2: i32) -> (i32, i32, i32) {
    %c0_i32 = arith.constant 0 : i32
    %c0_i32_0 = arith.constant 0 : i32
    return %arg0, %c0_i32, %arg2 : i32, i32, i32
  }
  func.func @transform_1(%arg0: i32, %arg1: i32, %arg2: i32) -> (i32, i32, i32) {
    %c1_i32 = arith.constant 1 : i32
    %0 = arith.addi %arg2, %c1_i32 : i32
    %c2_i32 = arith.constant 2 : i32
    %1 = arith.muli %0, %c2_i32 : i32
    %c0_i32 = arith.constant 0 : i32
    %c0_i32_0 = arith.constant 0 : i32
    return %arg0, %c0_i32, %1 : i32, i32, i32
  }
  func.func @transform_2(%arg0: i32, %arg1: i32, %arg2: i32) -> (i32, i32) {
    %c0_i32 = arith.constant 0 : i32
    %c0_i32_0 = arith.constant 0 : i32
    return %arg1, %c0_i32 : i32, i32
  }
  func.func @transform_3(%arg0: i32, %arg1: i32, %arg2: i32) -> (i32, i32, i32) {
    %c0_i32 = arith.constant 0 : i32
    return %arg0, %arg1, %arg2 : i32, i32, i32
  }
}

</mosaic_0001>

<bundles_post_ra>
// kernel: conv_forward.1
= control target key start
LH: loop header
LB: loop body
LE: loop exit
PB: predicated region body
PF: predicated region fallthrough
CT: control target
= control target key end

     0   :  { %s815_s12 = smov 0   ;;  %s817_s13 = smov 0   ;;  %s881_s0 = inlined_call_operand.vmem [shape: f32[2,4,384], index: 0, kind: input, shape index: {}, may-alias: {0,1}]   ;;  %s882_s1 = inlined_call_operand.vmem [shape: f32[2,4,384], index: 1, kind: input, shape index: {}, may-alias: {0,1}]   ;;  %s883_s2 = inlined_call_operand.vmem [shape: f32[8,37], index: 2, kind: input, shape index: {}]   ;;  %s884_s3 = inlined_call_operand.vmem [shape: f32[2,8,256], index: 3, kind: output, shape index: {}]  }
   0x1   :  { %s819_s14 = smov 0  }
   0x2 LB: > { %s32_s15 = sadd.s32 1, %s780_s13  ;;  %p669_p0 = scmp.ge.s32.totalorder %s784_s14, 1  ;;  %s784_s14 = sphi %s819_s14, %s13_s14   ;;  %s780_s13 = sphi %s817_s13, %s886_s13   ;;  %s776_s12 = sphi %s815_s12, %s885_s12  }
   0x3   : > { %p34_p1 = scmp.ge.s32.totalorder %s32_s15, 2  ;;  %p207_p2 = scmp.lt.s32.totalorder %s784_s14, 3 }
   0x5   : > { %s888_s15 = smov (%p34_p1, %s32_s15), 0  ;;  %p208_p3 = pnand %p669_p0, %p207_p2 }
   0x6   : > { %p266_p4 = scmp.lt.s32.totalorder (!%p208_p3), %s776_s12, 1  ;;  %s786_s24 = smov (!%p208_p3), 127   ;;  %v793_v4 = vmov (!%p208_p3), 0.0   ;;  %vm317_vm0 = vcmask (!%p208_p3), 1039360   ;;  %vm341_vm1 = vcmask (!%p208_p3), 916480   ;;  %vm329_vm2 = vcmask (!%p208_p3), 1031168  }
   0x7   : > { %211 = sbr.rel (%p208_p3) target bundleno = 389 (0x185), region = 32  ;;  %s787_s25 = smov (!%p208_p3), 112   ;;  %514 = vmatprep.mubr.f32.mxu0 (!%p208_p3), %v793_v4  ;;  %vm427_vm3 = vcmask (!%p208_p3), 1043456   ;;  %vm387_vm4 = vcmask (!%p208_p3), 777216   ;;  %vm364_vm5 = vcmask (!%p208_p3), 900096   ;;  %vm375_vm6 = vcmask (!%p208_p3), 785408  }
   0x8   : > { %s788_s26 = smov (!%p208_p3), 126   ;;  %s789_s27 = smov (!%p208_p3), 95   ;;  %vm352_vm7 = vcmask (!%p208_p3), 908288   ;;  %vm398_vm8 = vcmask (!%p208_p3), 769024   ;;  %vm443_vm9 = vcmask (!%p208_p3), 1044480   ;;  %vm439_vm10 = vcmask (!%p208_p3), 302080  }
   0x9   : > { %s790_s28 = smov (!%p208_p3), 110   ;;  %s791_s29 = smov (!%p208_p3), 96  }
   0xa   : > { %s792_s30 = smov (!%p208_p3), 111   ;;  %s794_s4 = smov (!%p208_p3), 94  }
   0xe   : > { %s890_s12 = smov (!%p266_p4, %s776_s12), 1 }
   0xf   : > { %s690_s16 = smul.u32 12, %s890_s12  ;;  %s681_s7 = sshll.u32 %s890_s12, 4 }
  0x10   : > { %s307_s10 = scalar_lea.vmem %s884_s3, %s681_s7 }
  0x11   : > { %s273_s19 = scalar_lea.vmem %s881_s0, %s690_s16  ;;  %s680_s20 = sadd.s32 8, %s690_s16 }
  0x12   : > { %v839_v0 = vld [vmem:[%s273_s19] sm:$0xff]  ;;  %s288_s23 = scalar_lea.vmem %s882_s1, %s680_s20 }
  0x13   : > { %313 = vrot.lane.b32.xlu1 %v839_v0, %s786_s24  ;;  %v310_v1 = vld [vmem:[%s288_s23] sm:$0xf]  ;;  %v312_v2 = vcombine.high %v839_v0, %v839_v0 }
  0x15   : > { %v726_v3 = vpack.i.bf16 %v310_v1, %v312_v2 }
  0x17   : > { %337 = vrot.lane.b32.xlu1 %v839_v0, %s787_s25  ;;  %727 = vrot.lane.b32.xlu0 %v726_v3, %s786_s24 }
  0x1b   : > { %325 = vrot.lane.b32.xlu1 %v839_v0, %s788_s26  ;;  %732 = vrot.lane.b32.xlu0 %v726_v3, %s787_s25 }
  0x1f   : > { %747 = vrot.lane.b32.xlu1 %v726_v3, %s789_s27  ;;  %737 = vrot.lane.b32.xlu0 %v726_v3, %s788_s26 }
  0x23   : > { %383 = vrot.lane.b32.xlu1 %v839_v0, %s789_s27  ;;  %742 = vrot.lane.b32.xlu0 %v726_v3, %s790_s28 }
  0x27   : > { %757 = vrot.lane.b32.xlu1 %v726_v3, %s791_s29  ;;  %360 = vrot.lane.b32.xlu0 %v839_v0, %s790_s28 }
  0x2b   : > { %371 = vrot.lane.b32.xlu1 %v839_v0, %s791_s29  ;;  %752 = vrot.lane.b32.xlu0 %v726_v3, %s792_s30 }
  0x2f   : > { %348 = vrot.lane.b32.xlu0 %v839_v0, %s792_s30  ;;  %402 = vrot.lane.b32.xlu1 %v310_v1, %s794_s4 }
  0x33   : > { %396 = vrot.lane.b32.xlu0 %v312_v2, %s794_s4 }
  0x37   : > { %394 = vrot.lane.b32.xlu0 %v839_v0, %s794_s4 }
  0x85   : > { %v314_v5 = vpop.permute.xlu1 %313 }
  0x89   : > { %v338_v6 = vpop.permute.xlu1 %337  ;;  %v728_v7 = vpop.permute.xlu0 %727 }
  0x8a   : > { %v730_v8 = vunpack.i.h.bf16 %v728_v7  ;;  %v729_v9 = vunpack.i.l.bf16 %v728_v7 }
  0x8c   : > { %v324_v14 = vsel %vm317_vm0, %v729_v9, %v730_v8  ;;  %v318_v15 = vsel %vm317_vm0, %v314_v5, %v729_v9  ;;  %v438_v9 = vld [vmem:[%s883_s2] sm:$0xff] }
  0x8d   : > { %v326_v10 = vpop.permute.xlu1 %325  ;;  %v733_v11 = vpop.permute.xlu0 %732  ;;  %v409_v20 = vrot.slane %v324_v14, 4  ;;  %v408_v21 = vrot.slane %v318_v15, 4 }
  0x8e   : > { %v735_v12 = vunpack.i.h.bf16 %v733_v11  ;;  %v734_v13 = vunpack.i.l.bf16 %v733_v11 }
  0x8f   : > { %v429_v30 = vsel %vm427_vm3, %v312_v2, %v409_v20  ;;  %v428_v36 = vsel %vm427_vm3, %v839_v0, %v408_v21 }
  0x90   : > { %v342_v16 = vsel %vm341_vm1, %v338_v6, %v734_v13  ;;  %v347_v17 = vsel %vm341_vm1, %v734_v13, %v735_v12 }
  0x91   : > { %v748_v18 = vpop.permute.xlu1 %747  ;;  %v738_v19 = vpop.permute.xlu0 %737  ;;  %v413_v24 = vrot.slane %v342_v16, 4  ;;  %v414_v25 = vrot.slane %v347_v17, 4 }
  0x92   : > { %v740_v22 = vunpack.i.h.bf16 %v738_v19  ;;  %v739_v23 = vunpack.i.l.bf16 %v738_v19  ;;  %v750_v33 = vunpack.i.h.bf16 %v748_v18  ;;  %v749_v34 = vunpack.i.l.bf16 %v748_v18 }
  0x94   : > { %v336_v26 = vsel %vm329_vm2, %v739_v23, %v740_v22  ;;  %v330_v27 = vsel %vm329_vm2, %v326_v10, %v739_v23  ;;  %v393_v42 = vsel %vm387_vm4, %v749_v34, %v750_v33 }
  0x95   : > { %v384_v28 = vpop.permute.xlu1 %383  ;;  %v743_v29 = vpop.permute.xlu0 %742  ;;  %v431_v31 = vsel %vm427_vm3, %v336_v26, %v414_v25  ;;  %v430_v32 = vsel %vm427_vm3, %v330_v27, %v413_v24  ;;  %v424_v47 = vrot.slane %v393_v42, 4 }
  0x96   : > { %v682_v35 = vpack.c.bf16 %v431_v31, %v429_v30  ;;  %v684_v37 = vpack.c.bf16 %v430_v32, %v428_v36  ;;  %v745_v38 = vunpack.i.h.bf16 %v743_v29  ;;  %v744_v39 = vunpack.i.l.bf16 %v743_v29 }
  0x97   : > { %v388_v46 = vsel %vm387_vm4, %v384_v28, %v749_v34 }
  0x98   : > { %683 = vmatprep.subr.bf16.mxu0 %v682_v35  ;;  %v370_v45 = vsel %vm364_vm5, %v744_v39, %v745_v38  ;;  %v423_v57 = vrot.slane %v388_v46, 4 }
  0x99   : > { %v758_v40 = vpop.permute.xlu1 %757  ;;  %v361_v41 = vpop.permute.xlu0 %360  ;;  %685 = vmatpush1.bf16.msra.mxu0 %v684_v37  ;;  %v419_v54 = vrot.slane %v370_v45, 4 }
  0x9a   : > { %v760_v43 = vunpack.i.h.bf16 %v758_v40  ;;  %v759_v44 = vunpack.i.l.bf16 %v758_v40  ;;  %v365_v50 = vsel %vm364_vm5, %v361_v41, %v744_v39 }
  0x9b   : > { %v418_v58 = vrot.slane %v365_v50, 4 }
  0x9c   : > { %v382_v51 = vsel %vm375_vm6, %v759_v44, %v760_v43 }
  0x9d   : > { %v372_v48 = vpop.permute.xlu1 %371  ;;  %v753_v49 = vpop.permute.xlu0 %752  ;;  %v435_v61 = vsel %vm427_vm3, %v382_v51, %v424_v47 }
  0x9e   : > { %v755_v52 = vunpack.i.h.bf16 %v753_v49  ;;  %v754_v53 = vunpack.i.l.bf16 %v753_v49  ;;  %v376_v55 = vsel %vm375_vm6, %v372_v48, %v759_v44 }
  0x9f   : > { %v434_v0 = vsel %vm427_vm3, %v376_v55, %v423_v57 }
  0xa0   : > { %v359_v56 = vsel %vm352_vm7, %v754_v53, %v755_v52 }
  0xa1   : > { %v349_v59 = vpop.permute.xlu0 %348  ;;  %v433_v60 = vsel %vm427_vm3, %v359_v56, %v419_v54  ;;  %v403_v2 = vpop.permute.xlu1 %402 }
  0xa2   : > { %v353_v62 = vsel %vm352_vm7, %v349_v59, %v754_v53  ;;  %v686_v63 = vpack.c.bf16 %v435_v61, %v433_v60 }
  0xa3   : > { %v432_v1 = vsel %vm427_vm3, %v353_v62, %v418_v58 }
  0xa4   : > { %687 = vmatprep.subr.bf16.mxu0 %v686_v63  ;;  %v688_v3 = vpack.c.bf16 %v434_v0, %v432_v1 }
  0xa5   : > { %v397_v4 = vpop.permute.xlu0 %396 }
  0xa6   : > { %v405_v5 = vsel %vm398_vm8, %v397_v4, %v403_v2  ;;  %689 = vmatpush1.bf16.msra.mxu0 %v688_v3 }
  0xa7   : > { %v437_v6 = vsel %vm427_vm3, %v405_v5, 1.0 }
  0xa8   : > { %674 = vmatprep.subr.msk.mxu0 %vm443_vm9, %v437_v6 }
  0xa9   : > { %v395_v7 = vpop.permute.xlu0 %394 }
  0xaa   : > { %v399_v8 = vsel %vm398_vm8, %v395_v7, %v397_v4 }
  0xab   : > { %v436_v10 = vsel %vm427_vm3, %v399_v8, 1.0 }
  0xac   : > { %675 = vmatpush1.msk.msra.mxu0 %vm443_vm9, %v436_v10 }
  0xad   : > { %676 = vmatmul.mubr.msk.f32.vlgmr.msra.gmra.mrb[0].mxu0 %vm439_vm10, %v438_v9 }
 0x180   : > { %v516_v11 = vpop.f32.mrb[0].mxu0 }
 0x181   : > { %v521_v12 = vmax.f32 %v516_v11, 0.0  ;;  %v518_v13 = vpop.f32.mrb[1].mxu0 }
 0x182   : > { %v522_v14 = vmax.f32 %v518_v13, 0.0 }
 0x183   : > { %523 = vst [vmem:[%s307_s10] sm:$0xff] %v521_v12 }
 0x184   : > { %524 = vst [vmem:[%s307_s10 + $0x8] sm:$0xff] %v522_v14 }
 0x185 PF: > { %s13_s14 = sadd.s32 1, %s784_s14   ;;  %s885_s12 = smov %s780_s13 }
 0x186   : > { %p10_p5 = scmp.ge.s32.totalorder %s13_s14, 4   ;;  %s886_s13 = smov %s888_s15 }
 0x188   :  { %12 = sbr.rel (!%p10_p5) target bundleno = 2 (0x2), region = 68 }

</bundles_post_ra>
